<compile_context>
chip_gen: v7x
topology: tpu7x:2x2x1
jax: 0.10.0
libtpu: 0.0.40
codegen_flags: <defaults>
</compile_context>

<pallas_src>
import math

import jax
import jax.numpy as jnp
from jax.experimental import pallas as pl
from jax.experimental.pallas import tpu as pltpu


def rgcn_kernel(adj_ref, xw_ref, o_ref):
    """One (destination-row tile, source-node tile) grid step, all relations.

    adj_ref: (R, TM, TN)     bf16  adjacency tile (rows = destination nodes)
    xw_ref:  (R, TN, D_pad)  bf16  precomputed XW_r = x @ W_r, source-tile slab
    o_ref:   (TM, D_pad)     f32   output rows (resident across source tiles)
    """
    j = pl.program_id(1)
    num_rels = adj_ref.shape[0]

    # One K = TN GEMM per relation, native bf16 MXU path, f32 accumulation.
    partial = jnp.dot(adj_ref[0], xw_ref[0], preferred_element_type=jnp.float32)
    for r in range(1, num_rels):
        partial = partial + jnp.dot(adj_ref[r], xw_ref[r],
                                    preferred_element_type=jnp.float32)

    @pl.when(j == 0)
    def _():
        o_ref[...] = jnp.zeros_like(o_ref)

    o_ref[...] += partial

    @pl.when(j == pl.num_programs(1) - 1)
    def _():
        # activation = ReLU, fused into the final (lane-dense) store.
        o_ref[...] = jnp.maximum(o_ref[...], 0.0)


def _pick_tile(total, target, quantum):
    """Largest multiple of `quantum` <= min(target, total) that divides `total`.

    Falls back to the full extent (always a legal block shape) so the wrapper
    never has to pad -- i.e. never re-streams the adjacency through HBM.
    """
    t = (min(target, total) // quantum) * quantum
    while t >= quantum:
        if total % t == 0:
            return t
        t -= quantum
    return total


def rgcn_conv_pallas(x, adj, w_eff, *, block_rows=256, block_src=512):
    """x: [N, D_in], adj: [R, N, N] (0/1), w_eff: [R*D_in, D_out] -> [N, D_out] f32."""
    N, D_in = x.shape
    R = adj.shape[0]
    assert adj.shape == (R, N, N)
    D_out = w_eff.shape[-1]
    assert w_eff.shape[0] == R * D_in

    # Adjacency should already be stored in a compact exact dtype (bf16 here;
    # int8 on v5e/v6e or fp8 on v7x would halve it again). 0/1 is exact in bf16.
    if adj.dtype != jnp.bfloat16:
        # TODO(synk): convert adjacency once at graph-build time and reuse; this
        # fallback re-streams the whole adjacency and should stay off hot paths.
        adj = adj.astype(jnp.bfloat16)

    # Lane-dense outputs: zero-pad the output dimension up to a multiple of 128.
    d_pad = ((D_out + 127) // 128) * 128
    w3 = w_eff.astype(jnp.float32).reshape(R, D_in, D_out)
    if d_pad != D_out:
        w3 = jnp.pad(w3, ((0, 0), (0, 0), (0, d_pad - D_out)))

    # Precompute XW_r = x @ W_r  -> (R, N, d_pad).  Small array; the extra flops
    # are free under the adjacency-bandwidth roofline, and it removes the
    # lane-sparse (TM, R*D_in) supports intermediate + concat from the kernel.
    xw = jnp.einsum("nd,rde->rne", x.astype(jnp.float32), w3,
                    precision=jax.lax.Precision.HIGHEST).astype(jnp.bfloat16)

    # Tile sizes: rows ("parallel"; keep >= 2 tiles so both v7x TCs get work)
    # and source nodes ("arbitrary" reduction axis; bounds VMEM independent of N).
    tm = _pick_tile(N, block_rows, 16)     # bf16 sublane packing
    tn = _pick_tile(N, block_src, 128)     # lane dim of the adjacency tile

    out = pl.pallas_call(
        rgcn_kernel,
        out_shape=jax.ShapeDtypeStruct((N, d_pad), jnp.float32),
        grid_spec=pltpu.PrefetchScalarGridSpec(
            num_scalar_prefetch=0,
            grid=(N // tm, N // tn),
            in_specs=[
                pl.BlockSpec((R, tm, tn), lambda i, j: (0, i, j)),      # adj tile
                pl.BlockSpec((R, tn, d_pad), lambda i, j: (0, j, 0)),   # XW slab
            ],
            out_specs=pl.BlockSpec((tm, d_pad), lambda i, j: (i, 0)),   # resident acc
        ),
        compiler_params=pltpu.CompilerParams(
            dimension_semantics=("parallel", "arbitrary"),
        ),
    )(adj, xw)
    return out[:, :D_out]


def xavier_uniform(key, shape, gain):
    # matches torch.nn.init.xavier_uniform_ for 2-D tensors
    fan_out, fan_in = shape[0], shape[1]
    bound = gain * math.sqrt(6.0 / (fan_in + fan_out))
    return jax.random.uniform(key, shape, jnp.float32, minval=-bound, maxval=bound)


def build_effective_weight(weight, w_comp, num_bases, num_rels, input_dim, output_dim):
    """Exactly mirrors the torch basis-decomposition code path (plain-JAX glue)."""
    if num_bases < num_rels:
        w = weight.reshape(num_bases, input_dim, output_dim)   # (B, D_in, D_out)
        w = jnp.transpose(w, (1, 0, 2))                        # (D_in, B, D_out)
        w = jnp.matmul(w_comp, w)                              # (D_in, R, D_out)
        w = w.reshape(input_dim * num_rels, output_dim)        # (D_in*R, D_out)
    else:
        w = weight
    return w


if __name__ == "__main__":
    # small, TPU-friendly shapes; 2 row tiles x 2 source tiles exercise both axes
    N = 256          # number of nodes
    D_in = 16        # input_dim
    D_out = 32       # output_dim
    R = 4            # num_rels
    B = 2            # num_bases (< num_rels -> basis decomposition path)

    key = jax.random.PRNGKey(0)
    k_x, k_adj, k_w, k_c = jax.random.split(key, 4)

    x = jax.random.normal(k_x, (N, D_in), jnp.float32)
    # adjacency built directly as bf16 "upstream" (graph build) -> no wrapper pass
    adj = (jax.random.uniform(k_adj, (R, N, N), jnp.float32) < 0.05).astype(jnp.bfloat16)

    # deterministic parameter init (xavier_uniform, gain = relu gain = sqrt(2))
    gain = math.sqrt(2.0)
    weight = xavier_uniform(k_w, (B * D_in, D_out), gain)   # (num_bases*input_dim, output_dim)
    w_comp = xavier_uniform(k_c, (R, B), gain)              # (num_rels, num_bases)
    w_eff = build_effective_weight(weight, w_comp, B, R, D_in, D_out)

    out = rgcn_conv_pallas(x, adj, w_eff, block_rows=128, block_src=128)
    out = jax.block_until_ready(out)
    assert out.shape == (N, D_out)

    adj_f32 = adj.astype(jnp.float32)
    hp = jax.lax.Precision.HIGHEST

    # (1) reference with the kernel's exact math (bf16-rounded XW, f32 accumulation)
    w3 = w_eff.reshape(R, D_in, D_out)
    xw_b = jnp.einsum("nd,rde->rne", x, w3,
                      precision=hp).astype(jnp.bfloat16).astype(jnp.float32)
    ref_kernel_math = jax.nn.relu(
        sum(jnp.matmul(adj_f32[r], xw_b[r], precision=hp) for r in range(R)))
    assert jnp.allclose(out, ref_kernel_math, atol=1e-2, rtol=1e-2), \
        "mismatch vs kernel-math reference"

    # (2) reference with the original module semantics (full f32); the only
    # difference is bf16 rounding of XW in the kernel, hence the looser tolerance.
    supports = jnp.concatenate(
        [jnp.matmul(adj_f32[r], x, precision=hp) for r in range(R)], axis=1)
    ref_spec = jax.nn.relu(jnp.matmul(supports, w_eff, precision=hp))
    assert jnp.allclose(out, ref_spec, atol=1e-1, rtol=1e-1), \
        "mismatch vs module-semantics reference"

    print("KERNEL_OK")
</pallas_src>

<mosaic_0001>
module attributes {stable_mosaic.version = 11 : i64} {
  func.func @rgcn_kernel(%arg0: i32, %arg1: i32, %arg2: memref<4x128x128xbf16, #tpu.memory_space<vmem>>, %arg3: memref<4x128x128xbf16, #tpu.memory_space<vmem>>, %arg4: memref<128x128xf32, #tpu.memory_space<vmem>>) attributes {dimension_semantics = [#tpu.dimension_semantics<parallel>, #tpu.dimension_semantics<arbitrary>], iteration_bounds = array<i64: 2, 2>, scalar_prefetch = 0 : i64, scratch_operands = 0 : i64, tpu.core_type = #tpu.core_type<tc>, window_params = [{transform_indices = @transform_0, window_bounds = array<i64: 4, 128, 128>}, {transform_indices = @transform_1, window_bounds = array<i64: 4, 128, 128>}, {transform_indices = @transform_2, window_bounds = array<i64: 128, 128>}]} {
    %c0 = arith.constant 0 : index
    %c0_0 = arith.constant 0 : index
    %c0_1 = arith.constant 0 : index
    %0 = vector.load %arg2[%c0, %c0_0, %c0_1] : memref<4x128x128xbf16, #tpu.memory_space<vmem>>, vector<1x128x128xbf16>
    %1 = vector.shape_cast %0 : vector<1x128x128xbf16> to vector<128x128xbf16>
    %c0_2 = arith.constant 0 : index
    %c0_3 = arith.constant 0 : index
    %c0_4 = arith.constant 0 : index
    %2 = vector.load %arg3[%c0_2, %c0_3, %c0_4] : memref<4x128x128xbf16, #tpu.memory_space<vmem>>, vector<1x128x128xbf16>
    %3 = vector.shape_cast %2 : vector<1x128x128xbf16> to vector<128x128xbf16>
    %cst = arith.constant dense<0.000000e+00> : vector<128x128xf32>
    %4 = tpu.matmul %1, %3, %cst {dimension_numbers = #tpu.dot_dimension_numbers<[1], [0], [0], [1], [0, 0, 1, 1], [], []>} : vector<128x128xbf16>, vector<128x128xbf16>, vector<128x128xf32> -> vector<128x128xf32>
    %c1 = arith.constant 1 : index
    %c0_5 = arith.constant 0 : index
    %c0_6 = arith.constant 0 : index
    %5 = vector.load %arg2[%c1, %c0_5, %c0_6] : memref<4x128x128xbf16, #tpu.memory_space<vmem>>, vector<1x128x128xbf16>
    %6 = vector.shape_cast %5 : vector<1x128x128xbf16> to vector<128x128xbf16>
    %c1_7 = arith.constant 1 : index
    %c0_8 = arith.constant 0 : index
    %c0_9 = arith.constant 0 : index
    %7 = vector.load %arg3[%c1_7, %c0_8, %c0_9] : memref<4x128x128xbf16, #tpu.memory_space<vmem>>, vector<1x128x128xbf16>
    %8 = vector.shape_cast %7 : vector<1x128x128xbf16> to vector<128x128xbf16>
    %cst_10 = arith.constant dense<0.000000e+00> : vector<128x128xf32>
    %9 = tpu.matmul %6, %8, %cst_10 {dimension_numbers = #tpu.dot_dimension_numbers<[1], [0], [0], [1], [0, 0, 1, 1], [], []>} : vector<128x128xbf16>, vector<128x128xbf16>, vector<128x128xf32> -> vector<128x128xf32>
    %10 = arith.addf %4, %9 : vector<128x128xf32>
    %c2 = arith.constant 2 : index
    %c0_11 = arith.constant 0 : index
    %c0_12 = arith.constant 0 : index
    %11 = vector.load %arg2[%c2, %c0_11, %c0_12] : memref<4x128x128xbf16, #tpu.memory_space<vmem>>, vector<1x128x128xbf16>
    %12 = vector.shape_cast %11 : vector<1x128x128xbf16> to vector<128x128xbf16>
    %c2_13 = arith.constant 2 : index
    %c0_14 = arith.constant 0 : index
    %c0_15 = arith.constant 0 : index
    %13 = vector.load %arg3[%c2_13, %c0_14, %c0_15] : memref<4x128x128xbf16, #tpu.memory_space<vmem>>, vector<1x128x128xbf16>
    %14 = vector.shape_cast %13 : vector<1x128x128xbf16> to vector<128x128xbf16>
    %cst_16 = arith.constant dense<0.000000e+00> : vector<128x128xf32>
    %15 = tpu.matmul %12, %14, %cst_16 {dimension_numbers = #tpu.dot_dimension_numbers<[1], [0], [0], [1], [0, 0, 1, 1], [], []>} : vector<128x128xbf16>, vector<128x128xbf16>, vector<128x128xf32> -> vector<128x128xf32>
    %16 = arith.addf %10, %15 : vector<128x128xf32>
    %c3 = arith.constant 3 : index
    %c0_17 = arith.constant 0 : index
    %c0_18 = arith.constant 0 : index
    %17 = vector.load %arg2[%c3, %c0_17, %c0_18] : memref<4x128x128xbf16, #tpu.memory_space<vmem>>, vector<1x128x128xbf16>
    %18 = vector.shape_cast %17 : vector<1x128x128xbf16> to vector<128x128xbf16>
    %c3_19 = arith.constant 3 : index
    %c0_20 = arith.constant 0 : index
    %c0_21 = arith.constant 0 : index
    %19 = vector.load %arg3[%c3_19, %c0_20, %c0_21] : memref<4x128x128xbf16, #tpu.memory_space<vmem>>, vector<1x128x128xbf16>
    %20 = vector.shape_cast %19 : vector<1x128x128xbf16> to vector<128x128xbf16>
    %cst_22 = arith.constant dense<0.000000e+00> : vector<128x128xf32>
    %21 = tpu.matmul %18, %20, %cst_22 {dimension_numbers = #tpu.dot_dimension_numbers<[1], [0], [0], [1], [0, 0, 1, 1], [], []>} : vector<128x128xbf16>, vector<128x128xbf16>, vector<128x128xf32> -> vector<128x128xf32>
    %22 = arith.addf %16, %21 : vector<128x128xf32>
    %c0_i32 = arith.constant 0 : i32
    %23 = arith.cmpi eq, %arg1, %c0_i32 : i32
    %24 = arith.extui %23 : i1 to i32
    %c0_i32_23 = arith.constant 0 : i32
    %25 = arith.cmpi ne, %24, %c0_i32_23 : i32
    scf.if %25 {
      %cst_29 = arith.constant 0.000000e+00 : f32
      %32 = vector.broadcast %cst_29 : f32 to vector<128x128xf32>
      %c0_30 = arith.constant 0 : index
      %c0_31 = arith.constant 0 : index
      %33 = vector.load %arg4[%c0_30, %c0_31] : memref<128x128xf32, #tpu.memory_space<vmem>>, vector<128x128xf32>
      tpu.vector_store %arg4[%c0_30, %c0_31], %32 {strides = array<i32>} : memref<128x128xf32, #tpu.memory_space<vmem>>, vector<128x128xf32>,
    } else {
    }
    %c0_24 = arith.constant 0 : index
    %c0_25 = arith.constant 0 : index
    %26 = vector.load %arg4[%c0_24, %c0_25] : memref<128x128xf32, #tpu.memory_space<vmem>>, vector<128x128xf32>
    %27 = arith.addf %26, %22 : vector<128x128xf32>
    %c0_26 = arith.constant 0 : index
    %c0_27 = arith.constant 0 : index
    %28 = vector.load %arg4[%c0_26, %c0_27] : memref<128x128xf32, #tpu.memory_space<vmem>>, vector<128x128xf32>
    tpu.vector_store %arg4[%c0_26, %c0_27], %27 {strides = array<i32>} : memref<128x128xf32, #tpu.memory_space<vmem>>, vector<128x128xf32>,
    %c1_i32 = arith.constant 1 : i32
    %29 = arith.cmpi eq, %arg1, %c1_i32 : i32
    %30 = arith.extui %29 : i1 to i32
    %c0_i32_28 = arith.constant 0 : i32
    %31 = arith.cmpi ne, %30, %c0_i32_28 : i32
    scf.if %31 {
      %c0_29 = arith.constant 0 : index
      %c0_30 = arith.constant 0 : index
      %32 = vector.load %arg4[%c0_29, %c0_30] : memref<128x128xf32, #tpu.memory_space<vmem>>, vector<128x128xf32>
      %cst_31 = arith.constant 0.000000e+00 : f32
      %33 = vector.broadcast %cst_31 : f32 to vector<128x128xf32>
      %34 = arith.maximumf %32, %33 : vector<128x128xf32>
      %c0_32 = arith.constant 0 : index
      %c0_33 = arith.constant 0 : index
      %35 = vector.load %arg4[%c0_32, %c0_33] : memref<128x128xf32, #tpu.memory_space<vmem>>, vector<128x128xf32>
      tpu.vector_store %arg4[%c0_32, %c0_33], %34 {strides = array<i32>} : memref<128x128xf32, #tpu.memory_space<vmem>>, vector<128x128xf32>,
    } else {
    }
    return
  }
  func.func @transform_0(%arg0: i32, %arg1: i32) -> (i32, i32, i32) {
    %c0_i32 = arith.constant 0 : i32
    %c0_i32_0 = arith.constant 0 : i32
    return %c0_i32, %arg0, %arg1 : i32, i32, i32
  }
  func.func @transform_1(%arg0: i32, %arg1: i32) -> (i32, i32, i32) {
    %c0_i32 = arith.constant 0 : i32
    %c0_i32_0 = arith.constant 0 : i32
    %c0_i32_1 = arith.constant 0 : i32
    return %c0_i32, %arg1, %c0_i32_0 : i32, i32, i32
  }
  func.func @transform_2(%arg0: i32, %arg1: i32) -> (i32, i32) {
    %c0_i32 = arith.constant 0 : i32
    %c0_i32_0 = arith.constant 0 : i32
    return %arg0, %c0_i32 : i32, i32
  }
}

</mosaic_0001>

<bundles_post_ra>
// kernel: tpu_custom_call.1
= control target key start
LH: loop header
LB: loop body
LE: loop exit
PB: predicated region body
PF: predicated region fallthrough
CT: control target
= control target key end

     0   :  { %7 = vsyncpa [#allocation3], 0  ;;  %s2761_s0 = inlined_call_operand.hbm [shape: bf16[4,256,256], index: 0, kind: input, shape index: {}]   ;;  %s2762_s1 = inlined_call_operand.hbm [shape: bf16[4,256,128], index: 1, kind: input, shape index: {}]   ;;  %s2763_s2 = inlined_call_operand.hbm [shape: f32[256,128], index: 2, kind: output, shape index: {}]  }
   0x1   :  { %9 = vsyncpa [#allocation3 + $0x1], 0 }
   0x2   :  { %10 = vsyncpa [#allocation6], 0 }
   0x3   :  { %12 = vsyncpa [#allocation6 + $0x1], 0 }
   0x4   :  { %13 = vsyncpa [#allocation4], 0 }
   0x5   :  { %15 = vsyncpa [#allocation4 + $0x1], 0  ;;  %s2283_s9 = smov 0   ;;  %s2285_s10 = smov 0  }
   0x6   :  { %s2287_s11 = smov 0   ;;  %s2289_s12 = smov 0  }
   0x7   :  { %s2291_s13 = smov 0   ;;  %s2293_s14 = smov 0  }
   0x8   :  { %s2295_s15 = smov 0   ;;  %s2297_s16 = smov 0  }
   0x9   :  { %s2299_s17 = smov 0   ;;  %s2301_s18 = smov 0  }
   0xa   :  { %s2303_s19 = smov 0   ;;  %s2305_s20 = smov 0  }
   0xb   :  { %s2307_s21 = smov 0   ;;  %s2309_s22 = smov 0  }
   0xc LB: > { %2771 = sst [smem:[#allocation17_spill]] %s2197_s9  ;;  %s2764_s23 = sadd.s32 4294967295, %s2249_s22   ;;  %s2249_s22 = sphi %s2309_s22, %s21_s22   ;;  %s2245_s21 = sphi %s2307_s21, %s2810_s21   ;;  %s2241_s20 = sphi %s2305_s20, %s2809_s20   ;;  %s2237_s19 = sphi %s2303_s19, %s2796_s19   ;;  %s2233_s18 = sphi %s2301_s18, %s2808_s18   ;;  %s2229_s17 = sphi %s2299_s17, %s2807_s17   ;;  %s2225_s16 = sphi %s2297_s16, %s2806_s16   ;;  %s2221_s15 = sphi %s2295_s15, %s2805_s15   ;;  %s2217_s14 = sphi %s2293_s14, %s2804_s14   ;;  %s2213_s13 = sphi %s2291_s13, %s2803_s13   ;;  %s2209_s12 = sphi %s2289_s12, %s2802_s12   ;;  %s2205_s11 = sphi %s2287_s11, %s2793_s11   ;;  %s2201_s10 = sphi %s2285_s10, %s2801_s10   ;;  %s2197_s9 = sphi %s2283_s9, %s2800_s9  }
   0xd   : > { %2772 = sst [smem:[#allocation18_spill]] %s2205_s11  ;;  %s30_s25 = sadd.s32 1, %s2241_s20 }
   0xe   : > { %2773 = sst [smem:[#allocation19_spill]] %s2245_s21  ;;  %s33_s26 = sadd.s32 1, %s2245_s21 }
   0xf   : > { %p31_p0 = scmp.ge.s32.totalorder %s30_s25, 2  ;;  %s42_s27 = sadd.s32 1, %s2229_s17 }
  0x10   : > { %p49_p1 = scmp.ne.s32.totalorder %s2229_s17, %s2225_s16  ;;  %p50_p2 = scmp.eq.s32.totalorder %s2249_s22, 0 }
  0x11   : > { %s2812_s25 = smov (%p31_p0, %s30_s25), 0  ;;  %s2814_s26 = smov (!%p31_p0, %s33_s26), %s2245_s21 }
  0x12   : > { %2774 = sst [smem:[#allocation20_spill]] %s2812_s25  ;;  %s38_s28 = ssub.s32 %s2241_s20, %s2812_s25 }
  0x13   : > { %p2366_p3 = por %p50_p2, %p49_p1  ;;  %p35_p4 = scmp.ge.s32.totalorder %s2814_s26, 2 }
  0x14   : > { %p55_p5 = scmp.ne.s32.totalorder %s2225_s16, %s2221_s15  ;;  %p2373_p6 = scmp.eq.s32.totalorder %s2764_s23, 0 }
  0x15   : > { %p66_p7 = scmp.eq.s32.totalorder %s38_s28, 0  ;;  %s2816_s26 = smov (%p35_p4, %s2814_s26), 0 }
  0x16   : > { %2777 = sst [smem:[#allocation21_spill]] %s2816_s26  ;;  %p2381_p8 = por %p2373_p6, %p55_p5 }
  0x17   : > { %s68_s4 = sadd.s32 1, %s2217_s14  ;;  %s37_s5 = ssub.s32 %s2245_s21, %s2816_s26 }
  0x18   : > { %p75_p9 = scmp.ne.s32.totalorder %s2217_s14, %s2213_s13  ;;  %s39_s6 = sor.u32 %s38_s28, %s37_s5 }
  0x19   : > { %p81_p10 = scmp.ne.s32.totalorder %s2213_s13, %s2209_s12  ;;  %p40_p11 = scmp.eq.s32.totalorder %s39_s6, 0 }
  0x1a   : > { %p2394_p12 = por %p75_p9, %p50_p2  ;;  %p92_p0 = scmp.eq.s32.totalorder %s37_s5, 0 }
  0x1b   : > { %s2399_s8 = scalar_select %p66_p7, %s2217_s14, %s68_s4  }
  0x1c   : > { %s2402_s15 = scalar_select %p40_p11, %s2229_s17, %s42_s27  }
  0x1d   : > { %2780 = sst [smem:[#allocation22_spill]] %s2399_s8  ;;  %p2406_p13 = por %p81_p10, %p2373_p6 }
  0x1e   : > { %2781 = sst [smem:[#allocation23_spill]] %s2402_s15  ;;  %s94_s23 = sadd.s32 1, %s2205_s11 }
  0x1f   : > { %p104_p1 = scmp.ne.s32.totalorder %s2205_s11, %s2201_s10  ;;  %s2784_s12 = sadd.s32 4294967295, %s2249_s22  }
  0x20   : > { %s2414_s28 = scalar_select %p92_p0, %s2205_s11, %s94_s23  }
  0x21   : > { %p105_p4 = scmp.eq.s32.totalorder %s2784_s12, 3  ;;  %p110_p2 = scmp.ne.s32.totalorder %s2201_s10, %s2197_s9 }
  0x22   : > { %2783 = sst [smem:[#allocation24_spill]] %s2414_s28  ;;  %s2785_s6 = sadd.s32 4294967294, %s2249_s22  }
  0x23   : > { %p111_p5 = scmp.eq.s32.totalorder %s2785_s6, 3  ;;  %p2422_p9 = por %p105_p4, %p104_p1 }
  0x24   : > { %p1456_p6 = scmp.ge.s32.totalorder %s2249_s22, 4 }
  0x25   : > { %p2426_p7 = por %p111_p5, %p110_p2 }
  0x26   : > { %127 = sbr.rel (%p1456_p6) target bundleno = 73 (0x49), region = 16 }
  0x27   : > { %s2787_s27 = scalar_select %p2426_p7, 1, 0 }
  0x29   : > { %2788 = sst [smem:[#allocation25_spill]] %s2787_s27 }
  0x2d   : > { %s131_s23 = sand.u32 1, %s2229_s17   ;;  %s1639_s30 = sshll.u32 %s2245_s21, 5 }
  0x2e   : > { %s1457_s5 = sshll.u32 %s131_s23, 8  ;;  %s141_s12 = sadd.s32 %s2241_s20, %s1639_s30 }
  0x2f   : > { %s1460_s6 = sshll.u32 %s141_s12, 6  ;;  %s135_s26 = scalar_lea.vmem [#allocation2], %s1457_s5 }
  0x30   : > { %s156_s25 = sshll.u32 %s135_s26, 4  ;;  %s143_s28 = scalar_lea.hbm %s2761_s0, %s1460_s6  ;;  %s157_s25 = int_to_ptr.vmem [resolvable:$true] %s156_s25 }
  0x31   : > { %s1882_s11 = scalar_select %p2366_p3, [#allocation0], [#allocation12] }
  0x32   : > { %s2251_s9 = smov 4096   ;;  %s2252_s21 = smov 1024  }
  0x33   : > { %s148_s27 = sld [smem:[%s1882_s11]]   ;;  %s2253_s30 = smov 16  }
  0x34   : > { %1883 = sst [smem:[#allocation9]] (%p2366_p3), %s2251_s9  ;;  %s2254_s26 = smov 128  }
  0x35   : > { %1884 = sst [smem:[#allocation9 + $0x1]] (%p2366_p3), %s2252_s21  ;;  %s2255_s8 = smov 64  }
  0x36   : > { %1885 = sst [smem:[#allocation9 + $0x2]] (%p2366_p3), %s2253_s30  ;;  %s2256_s15 = smov 4  }
  0x37   : > { %1886 = sst [smem:[#allocation9 + $0x3]] (%p2366_p3), %s2254_s26  ;;  %s132_s12 = scalar_lea.sflag [#allocation3], %s131_s23 }
  0x38   : > { %1887 = sst [smem:[#allocation9 + $0x4]] (%p2366_p3), %s2255_s8  ;;  %s2257_s6 = smov [#allocation8]  }
  0x39   : > { %1888 = sst [smem:[#allocation9 + $0x5]] (%p2366_p3), %s2256_s15  ;;  %s1461_s11 = sshll.u32 %s148_s27, 26 }
  0x3a   : > { %s1462_s5 = sadd.s32 134217728, %s1461_s11 }
  0x3b   : > { %1889 = dma.general (%p2366_p3), %s143_s28, 4096, %s157_s25, %s132_s12, %s2257_s6, [#allocation9], %s1462_s5, 0  }
  0x3c   : > { %s179_s9 = sand.u32 1, %s2217_s14   ;;  %s1640_s21 = sshll.u32 %s2241_s20, 10 }
  0x3d   : > { %s1463_s30 = sshll.u32 %s179_s9, 8  ;;  %s189_s27 = scalar_lea.hbm %s2762_s1, %s1640_s21 }
  0x3e   : > { %s1890_s23 = scalar_select %p2394_p12, [#allocation0], [#allocation13] }
  0x3f   : > { %s183_s29 = scalar_lea.vmem [#allocation5], %s1463_s30  ;;  %s2258_s15 = smov 2048  }
  0x40   : > { %s202_s25 = sshll.u32 %s183_s29, 4  ;;  %s194_s28 = sld [smem:[%s1890_s23]]   ;;  %s203_s25 = int_to_ptr.vmem [resolvable:$true] %s202_s25 }
  0x41   : > { %1891 = sst [smem:[#allocation11]] (%p2394_p12), %s2258_s15  ;;  %s2259_s11 = smov 1024  }
  0x42   : > { %1892 = sst [smem:[#allocation11 + $0x1]] (%p2394_p12), %s2259_s11  ;;  %s2260_s5 = smov 16  }
  0x43   : > { %1893 = sst [smem:[#allocation11 + $0x2]] (%p2394_p12), %s2260_s5  ;;  %s2261_s12 = smov 64  }
  0x44   : > { %1894 = sst [smem:[#allocation11 + $0x3]] (%p2394_p12), %s2261_s12  ;;  %s2262_s21 = smov 4  }
  0x45   : > { %1895 = sst [smem:[#allocation11 + $0x4]] (%p2394_p12), %s2261_s12  ;;  %s180_s26 = scalar_lea.sflag [#allocation6], %s179_s9 }
  0x46   : > { %s1466_s6 = sshll.u32 %s194_s28, 26  ;;  %1896 = sst [smem:[#allocation11 + $0x5]] (%p2394_p12), %s2262_s21 }
  0x47   : > { %s1467_s30 = sadd.s32 134217728, %s1466_s6  ;;  %s2263_s8 = smov [#allocation10]  }
  0x48   : > { %1897 = dma.general (%p2394_p12), %s189_s27, 4096, %s203_s25, %s180_s26, %s2263_s8, [#allocation11], %s1467_s30, 0  }
  0x49 PF: > { %p1468_p3 = scmp.ge.s32.totalorder %s2249_s22, 1  ;;  %p223_p10 = scmp.lt.s32.totalorder %s2249_s22, 5 }
  0x4b   : > { %p224_p11 = pnand %p1468_p3, %p223_p10 }
  0x4c   : > { %s229_s23 = sand.u32 (!%p224_p11), 1, %s2225_s16  }
  0x4d   : > { %227 = sbr.rel (%p224_p11) target bundleno = 441 (0x1b9), region = 28  ;;  %s1469_s29 = sshll.u32 (!%p224_p11), %s229_s23, 8 }
  0x4e   : > { %s230_s28 = scalar_lea.sflag (!%p224_p11), [#allocation3], %s229_s23  ;;  %s2477_s15 = scalar_lea.vmem (!%p224_p11), [#allocation2], %s1469_s29 }
  0x54   : > { %2184 = dma.done.wait (%p2381_p8), %s230_s28, 4096  }
  0x55   : > { %2186 = vsyncadd (%p2381_p8), %s230_s28, 4294963200  ;;  %s238_s7 = sand.u32 1, %s2213_s13  }
  0x56   : > { %s1470_s9 = sshll.u32 %s238_s7, 8  ;;  %s239_s27 = scalar_lea.sflag [#allocation6], %s238_s7 }
  0x57   : > { %s2484_s25 = scalar_lea.vmem [#allocation5], %s1470_s9 }
  0x58   : > { %2188 = dma.done.wait (%p2406_p13), %s239_s27, 4096  }
  0x59   : > { %2190 = vsyncadd (%p2406_p13), %s239_s27, 4294963200  ;;  %s265_s3 = sand.u32 1, %s2201_s10   ;;  %v2035_v0 = vld [vmem:[%s2484_s25 + $0x40] sm:$0xff]   ;;  %v2037_v2 = vld [vmem:[%s2484_s25 + $0x48] sm:$0xff]   ;;  %p1632_p8 = scmp.ne.s32.totalorder %s2233_s18, 0 }
  0x5a   : > { %s2493_s11 = sshll.u32 %s265_s3, 7  ;;  %v2036_v1 = vld [vmem:[%s2484_s25 + $0x80] sm:$0xff]   ;;  %1706 = vmatprep.subr.bf16.mxu1 %v2035_v0  ;;  %v2038_v3 = vld [vmem:[%s2484_s25 + $0x88] sm:$0xff]   ;;  %v2039_v4 = vld [vmem:[%s2484_s25 + $0x50] sm:$0xff]  }
  0x5b   : > { %1770 = vmatprep.subr.bf16.mxu0 %v2036_v1  ;;  %1707 = vmatpush3.bf16.msra.mxu1 %v2035_v0  ;;  %v2040_v5 = vld [vmem:[%s2484_s25 + $0x90] sm:$0xff]   ;;  %v2041_v6 = vld [vmem:[%s2484_s25 + $0x58] sm:$0xff]   ;;  %v2043_v8 = vld [vmem:[%s2484_s25 + $0x60] sm:$0xff]   ;;  %s2580_s24 = scalar_lea.vmem [#allocation7], %s2493_s11 }
  0x5c   : > { %1771 = vmatpush3.bf16.msra.mxu0 %v2036_v1  ;;  %1708 = vmatprep.subr.bf16.mxu1 %v2037_v2  ;;  %v2042_v7 = vld [vmem:[%s2484_s25 + $0x98] sm:$0xff]   ;;  %v2044_v9 = vld [vmem:[%s2484_s25 + $0xa0] sm:$0xff]   ;;  %v2045_v10 = vld [vmem:[%s2484_s25 + $0x68] sm:$0xff]  }
  0x5d   : > { %1772 = vmatprep.subr.bf16.mxu0 %v2038_v3  ;;  %v2046_v11 = vld [vmem:[%s2484_s25 + $0xa8] sm:$0xff]   ;;  %v2051_v12 = vld [vmem:[%s2477_s15 + $0x40] sm:$0xff]   ;;  %v2047_v14 = vld [vmem:[%s2484_s25 + $0x70] sm:$0xff]  }
  0x5e   : > { %v2052_v13 = vld [vmem:[%s2477_s15 + $0x80] sm:$0xff]   ;;  %1722 = vmatprep.mubr.bf16.mxu1 %v2051_v12  ;;  %v2048_v15 = vld [vmem:[%s2484_s25 + $0xb0] sm:$0xff]   ;;  %v2049_v16 = vld [vmem:[%s2484_s25 + $0x78] sm:$0xff]  }
  0x5f   : > { %1709 = vmatpush3.bf16.msra.mxu1 %v2037_v2  ;;  %1786 = vmatprep.mubr.bf16.mxu0 %v2052_v13  ;;  %v2050_v17 = vld [vmem:[%s2484_s25 + $0xb8] sm:$0xff]   ;;  %v2053_v18 = vld [vmem:[%s2477_s15 + $0x48] sm:$0xff]   ;;  %v2054_v19 = vld [vmem:[%s2484_s25] sm:$0xff]  }
  0x60   : > { %1773 = vmatpush3.bf16.msra.mxu0 %v2038_v3  ;;  %1710 = vmatprep.subr.bf16.mxu1 %v2039_v4  ;;  %v2056_v20 = vld [vmem:[%s2484_s25 + $0xc0] sm:$0xff]   ;;  %v2055_v21 = vld [vmem:[%s2477_s15 + $0x88] sm:$0xff]   ;;  %v2059_v24 = vld [vmem:[%s2477_s15 + $0x50] sm:$0xff]  }
  0x61   : > { %1774 = vmatprep.subr.bf16.mxu0 %v2040_v5  ;;  %v2057_v22 = vld [vmem:[%s2484_s25 + $0x8] sm:$0xff]   ;;  %v2060_v25 = vld [vmem:[%s2477_s15 + $0x90] sm:$0xff]   ;;  %v2061_v26 = vld [vmem:[%s2477_s15 + $0x58] sm:$0xff]  }
  0x62   : > { %v2058_v23 = vld [vmem:[%s2484_s25 + $0xc8] sm:$0xff]   ;;  %v2062_v27 = vld [vmem:[%s2484_s25 + $0x10] sm:$0xff]   ;;  %v2063_v29 = vld [vmem:[%s2477_s15 + $0x98] sm:$0xff]  }
  0x63   : > { %1711 = vmatpush3.bf16.msra.mxu1 %v2039_v4  ;;  %v2064_v28 = vld [vmem:[%s2484_s25 + $0xd0] sm:$0xff]   ;;  %v2065_v30 = vld [vmem:[%s2484_s25 + $0x18] sm:$0xff]   ;;  %v2067_v32 = vld [vmem:[%s2477_s15 + $0x60] sm:$0xff]  }
  0x64   : > { %1775 = vmatpush3.bf16.msra.mxu0 %v2040_v5  ;;  %1712 = vmatprep.subr.bf16.mxu1 %v2041_v6  ;;  %v2066_v31 = vld [vmem:[%s2484_s25 + $0xd8] sm:$0xff]   ;;  %v2068_v33 = vld [vmem:[%s2477_s15 + $0xa0] sm:$0xff]   ;;  %v2069_v34 = vld [vmem:[%s2477_s15 + $0x68] sm:$0xff]  }
  0x65   : > { %1776 = vmatprep.subr.bf16.mxu0 %v2042_v7  ;;  %v2070_v35 = vld [vmem:[%s2484_s25 + $0x20] sm:$0xff]   ;;  %v2071_v37 = vld [vmem:[%s2477_s15 + $0xa8] sm:$0xff]   ;;  %v2075_v40 = vld [vmem:[%s2477_s15 + $0x70] sm:$0xff]  }
  0x66   : > { %v2072_v36 = vld [vmem:[%s2484_s25 + $0xe0] sm:$0xff]   ;;  %v2073_v38 = vld [vmem:[%s2484_s25 + $0x28] sm:$0xff]   ;;  %v2076_v41 = vld [vmem:[%s2477_s15 + $0xb0] sm:$0xff]  }
  0x67   : > { %1713 = vmatpush3.bf16.msra.mxu1 %v2041_v6  ;;  %v2074_v39 = vld [vmem:[%s2484_s25 + $0xe8] sm:$0xff]   ;;  %v2077_v42 = vld [vmem:[%s2477_s15 + $0x78] sm:$0xff]   ;;  %v2078_v43 = vld [vmem:[%s2484_s25 + $0x30] sm:$0xff]  }
  0x68   : > { %1777 = vmatpush3.bf16.msra.mxu0 %v2042_v7  ;;  %1714 = vmatprep.subr.bf16.mxu1 %v2043_v8  ;;  %v2080_v44 = vld [vmem:[%s2484_s25 + $0xf0] sm:$0xff]   ;;  %v2079_v45 = vld [vmem:[%s2477_s15 + $0xb8] sm:$0xff]   ;;  %v2083_v48 = vld [vmem:[%s2477_s15] sm:$0xff]  }
  0x69   : > { %1778 = vmatprep.subr.bf16.mxu0 %v2044_v9  ;;  %v2081_v46 = vld [vmem:[%s2484_s25 + $0x38] sm:$0xff]   ;;  %v2084_v49 = vld [vmem:[%s2477_s15 + $0xc0] sm:$0xff]   ;;  %v2085_v50 = vld [vmem:[%s2477_s15 + $0x8] sm:$0xff]  }
  0x6a   : > { %v2082_v47 = vld [vmem:[%s2484_s25 + $0xf8] sm:$0xff]   ;;  %v2086_v51 = vld [vmem:[%s2477_s15 + $0xc8] sm:$0xff]   ;;  %v2087_v52 = vld [vmem:[%s2477_s15 + $0x10] sm:$0xff]  }
  0x6b   : > { %1715 = vmatpush3.bf16.msra.mxu1 %v2043_v8  ;;  %v2088_v53 = vld [vmem:[%s2477_s15 + $0xd0] sm:$0xff]   ;;  %v2089_v54 = vld [vmem:[%s2477_s15 + $0x18] sm:$0xff]   ;;  %v2091_v56 = vld [vmem:[%s2477_s15 + $0x20] sm:$0xff]  }
  0x6c   : > { %1779 = vmatpush3.bf16.msra.mxu0 %v2044_v9  ;;  %1716 = vmatprep.subr.bf16.mxu1 %v2045_v10  ;;  %v2090_v55 = vld [vmem:[%s2477_s15 + $0xd8] sm:$0xff]   ;;  %v2092_v57 = vld [vmem:[%s2477_s15 + $0xe0] sm:$0xff]   ;;  %v2093_v58 = vld [vmem:[%s2477_s15 + $0x28] sm:$0xff]  }
  0x6d   : > { %1780 = vmatprep.subr.bf16.mxu0 %v2046_v11  ;;  %v2094_v59 = vld [vmem:[%s2477_s15 + $0xe8] sm:$0xff]   ;;  %v2095_v60 = vld [vmem:[%s2477_s15 + $0x30] sm:$0xff]   ;;  %v2097_v62 = vld [vmem:[%s2477_s15 + $0x38] sm:$0xff]  }
  0x6e   : > { %v2096_v61 = vld [vmem:[%s2477_s15 + $0xf0] sm:$0xff]   ;;  %v2098_v63 = vld [vmem:[%s2477_s15 + $0xf8] sm:$0xff]  }
  0x6f   : > { %1717 = vmatpush3.bf16.msra.mxu1 %v2045_v10 }
  0x70   : > { %1781 = vmatpush3.bf16.msra.mxu0 %v2046_v11  ;;  %1718 = vmatprep.subr.bf16.mxu1 %v2047_v14 }
  0x71   : > { %1782 = vmatprep.subr.bf16.mxu0 %v2048_v15 }
  0x73   : > { %1719 = vmatpush3.bf16.msra.mxu1 %v2047_v14 }
  0x74   : > { %1783 = vmatpush3.bf16.msra.mxu0 %v2048_v15  ;;  %1720 = vmatprep.subr.bf16.mxu1 %v2049_v16 }
  0x75   : > { %1784 = vmatprep.subr.bf16.mxu0 %v2050_v17 }
  0x77   : > { %1721 = vmatpush3.bf16.msra.mxu1 %v2049_v16 }
  0x78   : > { %1785 = vmatpush3.bf16.msra.mxu0 %v2050_v17  ;;  %1738 = vmatprep.subr.bf16.mxu1 %v2054_v19 }
  0x79   : > { %1802 = vmatprep.subr.bf16.mxu0 %v2056_v20 }
  0x7a   : > { %1723 = vmatmul.mubr.bf16.vlgmr.msra.gmra.mrb[0].mxu1 %v2053_v18 }
  0x7b   : > { %1787 = vmatmul.mubr.bf16.vlgmr.msra.gmra.mrb[0].mxu0 %v2055_v21  ;;  %1739 = vmatpush3.bf16.msra.mxu1 %v2054_v19 }
  0x7c   : > { %1803 = vmatpush3.bf16.msra.mxu0 %v2056_v20  ;;  %1740 = vmatprep.subr.bf16.mxu1 %v2057_v22 }
  0x7d   : > { %1804 = vmatprep.subr.bf16.mxu0 %v2058_v23  ;;  %1726 = vmatprep.mubr.bf16.mxu1 %v2059_v24 }
  0x7e   : > { %1790 = vmatprep.mubr.bf16.mxu0 %v2060_v25 }
  0x7f   : > { %1741 = vmatpush3.bf16.msra.mxu1 %v2057_v22 }
  0x80   : > { %1805 = vmatpush3.bf16.msra.mxu0 %v2058_v23  ;;  %1742 = vmatprep.subr.bf16.mxu1 %v2062_v27 }
  0x81   : > { %1806 = vmatprep.subr.bf16.mxu0 %v2064_v28 }
  0x82   : > { %1727 = vmatmul.mubr.bf16.gmra.mrb[4].mxu1 %v2061_v26 }
  0x83   : > { %1791 = vmatmul.mubr.bf16.gmra.mrb[4].mxu0 %v2063_v29  ;;  %1743 = vmatpush3.bf16.msra.mxu1 %v2062_v27 }
  0x84   : > { %1807 = vmatpush3.bf16.msra.mxu0 %v2064_v28  ;;  %1744 = vmatprep.subr.bf16.mxu1 %v2065_v30 }
  0x85   : > { %1808 = vmatprep.subr.bf16.mxu0 %v2066_v31  ;;  %1730 = vmatprep.mubr.bf16.mxu1 %v2067_v32 }
  0x86   : > { %1794 = vmatprep.mubr.bf16.mxu0 %v2068_v33 }
  0x87   : > { %1745 = vmatpush3.bf16.msra.mxu1 %v2065_v30 }
  0x88   : > { %1809 = vmatpush3.bf16.msra.mxu0 %v2066_v31  ;;  %1746 = vmatprep.subr.bf16.mxu1 %v2070_v35 }
  0x89   : > { %1810 = vmatprep.subr.bf16.mxu0 %v2072_v36 }
  0x8a   : > { %1731 = vmatmul.mubr.bf16.gmra.mrb[8].mxu1 %v2069_v34 }
  0x8b   : > { %1795 = vmatmul.mubr.bf16.gmra.mrb[8].mxu0 %v2071_v37  ;;  %1747 = vmatpush3.bf16.msra.mxu1 %v2070_v35 }
  0x8c   : > { %1811 = vmatpush3.bf16.msra.mxu0 %v2072_v36  ;;  %1748 = vmatprep.subr.bf16.mxu1 %v2073_v38 }
  0x8d   : > { %1812 = vmatprep.subr.bf16.mxu0 %v2074_v39  ;;  %1734 = vmatprep.mubr.bf16.mxu1 %v2075_v40 }
  0x8e   : > { %1798 = vmatprep.mubr.bf16.mxu0 %v2076_v41 }
  0x8f   : > { %1749 = vmatpush3.bf16.msra.mxu1 %v2073_v38 }
  0x90   : > { %1813 = vmatpush3.bf16.msra.mxu0 %v2074_v39  ;;  %1750 = vmatprep.subr.bf16.mxu1 %v2078_v43 }
  0x91   : > { %1814 = vmatprep.subr.bf16.mxu0 %v2080_v44 }
  0x92   : > { %1735 = vmatmul.mubr.bf16.gmra.mrb[12].mxu1 %v2077_v42 }
  0x93   : > { %1799 = vmatmul.mubr.bf16.gmra.mrb[12].mxu0 %v2079_v45  ;;  %1751 = vmatpush3.bf16.msra.mxu1 %v2078_v43 }
  0x94   : > { %1815 = vmatpush3.bf16.msra.mxu0 %v2080_v44  ;;  %1752 = vmatprep.subr.bf16.mxu1 %v2081_v46 }
  0x95   : > { %1816 = vmatprep.subr.bf16.mxu0 %v2082_v47  ;;  %1754 = vmatprep.mubr.bf16.mxu1 %v2083_v48  ;;  %v2264_v48 = vmov (!%p1632_p8), 0.0  }
  0x96   : > { %1818 = vmatprep.mubr.bf16.mxu0 %v2084_v49  ;;  %1214 = vst [vmem:[%s2580_s24] sm:$0xff] (!%p1632_p8), %v2264_v48  ;;  %1215 = vst [vmem:[%s2580_s24 + $0x8] sm:$0xff] (!%p1632_p8), %v2264_v48 }
  0x97   : > { %1753 = vmatpush3.bf16.msra.mxu1 %v2081_v46  ;;  %1216 = vst [vmem:[%s2580_s24 + $0x10] sm:$0xff] (!%p1632_p8), %v2264_v48  ;;  %1217 = vst [vmem:[%s2580_s24 + $0x18] sm:$0xff] (!%p1632_p8), %v2264_v48 }
  0x98   : > { %1817 = vmatpush3.bf16.msra.mxu0 %v2082_v47  ;;  %1218 = vst [vmem:[%s2580_s24 + $0x20] sm:$0xff] (!%p1632_p8), %v2264_v48  ;;  %1219 = vst [vmem:[%s2580_s24 + $0x28] sm:$0xff] (!%p1632_p8), %v2264_v48 }
  0x99   : > { %1220 = vst [vmem:[%s2580_s24 + $0x30] sm:$0xff] (!%p1632_p8), %v2264_v48  ;;  %1221 = vst [vmem:[%s2580_s24 + $0x38] sm:$0xff] (!%p1632_p8), %v2264_v48 }
  0x9a   : > { %1755 = vmatmul.mubr.bf16.vlgmr.msra.gmra.mrb[0].mxu1 %v2085_v50  ;;  %1222 = vst [vmem:[%s2580_s24 + $0x40] sm:$0xff] (!%p1632_p8), %v2264_v48  ;;  %1223 = vst [vmem:[%s2580_s24 + $0x48] sm:$0xff] (!%p1632_p8), %v2264_v48 }
  0x9b   : > { %1819 = vmatmul.mubr.bf16.vlgmr.msra.gmra.mrb[0].mxu0 %v2086_v51  ;;  %1758 = vmatprep.mubr.bf16.mxu1 %v2087_v52  ;;  %1224 = vst [vmem:[%s2580_s24 + $0x50] sm:$0xff] (!%p1632_p8), %v2264_v48  ;;  %1225 = vst [vmem:[%s2580_s24 + $0x58] sm:$0xff] (!%p1632_p8), %v2264_v48 }
  0x9c   : > { %1822 = vmatprep.mubr.bf16.mxu0 %v2088_v53  ;;  %1226 = vst [vmem:[%s2580_s24 + $0x60] sm:$0xff] (!%p1632_p8), %v2264_v48  ;;  %1227 = vst [vmem:[%s2580_s24 + $0x68] sm:$0xff] (!%p1632_p8), %v2264_v48 }
  0x9d   : > { %1228 = vst [vmem:[%s2580_s24 + $0x70] sm:$0xff] (!%p1632_p8), %v2264_v48  ;;  %1229 = vst [vmem:[%s2580_s24 + $0x78] sm:$0xff] (!%p1632_p8), %v2264_v48 }
  0xa2   : > { %1759 = vmatmul.mubr.bf16.gmra.mrb[4].mxu1 %v2089_v54 }
  0xa3   : > { %1823 = vmatmul.mubr.bf16.gmra.mrb[4].mxu0 %v2090_v55  ;;  %1762 = vmatprep.mubr.bf16.mxu1 %v2091_v56 }
  0xa4   : > { %1826 = vmatprep.mubr.bf16.mxu0 %v2092_v57 }
  0xaa   : > { %1763 = vmatmul.mubr.bf16.gmra.mrb[8].mxu1 %v2093_v58 }
  0xab   : > { %1827 = vmatmul.mubr.bf16.gmra.mrb[8].mxu0 %v2094_v59  ;;  %1766 = vmatprep.mubr.bf16.mxu1 %v2095_v60 }
  0xac   : > { %1830 = vmatprep.mubr.bf16.mxu0 %v2096_v61 }
  0xb2   : > { %1767 = vmatmul.mubr.bf16.gmra.mrb[12].mxu1 %v2097_v62 }
  0xb3   : > { %1831 = vmatmul.mubr.bf16.gmra.mrb[12].mxu0 %v2098_v63 }
 0x16d   : > { %v1756_v0 = vpop.f32.mrb[0].mxu1 }
 0x16e   : > { %v1820_v1 = vpop.f32.mrb[0].mxu0  ;;  %v661_v2 = vpop.f32.mrb[1].mxu1 }
 0x16f   : > { %v2559_v3 = vadd.f32 %v1820_v1, %v1756_v0  ;;  %v1131_v4 = vpop.f32.mrb[1].mxu0  ;;  %v1757_v5 = vpop.f32.mrb[2].mxu1 }
 0x170   : > { %v2561_v6 = vadd.f32 %v1131_v4, %v661_v2  ;;  %v1821_v7 = vpop.f32.mrb[2].mxu0  ;;  %v664_v8 = vpop.f32.mrb[3].mxu1 }
 0x171   : > { %v2563_v9 = vadd.f32 %v1821_v7, %v1757_v5  ;;  %v1134_v10 = vpop.f32.mrb[3].mxu0 }
 0x172   : > { %v1837_v11 = vadd.f32 %v1134_v10, %v664_v8 }
 0x175   : > { %v1760_v12 = vpop.f32.mrb[4].mxu1 }
 0x176   : > { %v1824_v13 = vpop.f32.mrb[4].mxu0  ;;  %v677_v14 = vpop.f32.mrb[5].mxu1 }
 0x177   : > { %v2565_v15 = vadd.f32 %v1824_v13, %v1760_v12  ;;  %v1147_v16 = vpop.f32.mrb[5].mxu0  ;;  %v1761_v17 = vpop.f32.mrb[6].mxu1 }
 0x178   : > { %v1839_v18 = vadd.f32 %v1147_v16, %v677_v14  ;;  %v1825_v19 = vpop.f32.mrb[6].mxu0  ;;  %v680_v20 = vpop.f32.mrb[7].mxu1 }
 0x179   : > { %v2567_v21 = vadd.f32 %v1825_v19, %v1761_v17  ;;  %v1150_v22 = vpop.f32.mrb[7].mxu0 }
 0x17a   : > { %v1841_v23 = vadd.f32 %v1150_v22, %v680_v20 }
 0x17d   : > { %v1764_v24 = vpop.f32.mrb[8].mxu1 }
 0x17e   : > { %v1828_v25 = vpop.f32.mrb[8].mxu0  ;;  %v693_v26 = vpop.f32.mrb[9].mxu1 }
 0x17f   : > { %v2569_v27 = vadd.f32 %v1828_v25, %v1764_v24  ;;  %v1163_v28 = vpop.f32.mrb[9].mxu0  ;;  %v1765_v29 = vpop.f32.mrb[10].mxu1 }
 0x180   : > { %v1843_v30 = vadd.f32 %v1163_v28, %v693_v26  ;;  %v1829_v31 = vpop.f32.mrb[10].mxu0  ;;  %v696_v32 = vpop.f32.mrb[11].mxu1 }
 0x181   : > { %v2571_v33 = vadd.f32 %v1829_v31, %v1765_v29  ;;  %v1166_v34 = vpop.f32.mrb[11].mxu0 }
 0x182   : > { %v1845_v35 = vadd.f32 %v1166_v34, %v696_v32 }
 0x184   : > { %1213 = sbr.rel (%p1632_p8) target bundleno = 395 (0x18b), region = 40 }
 0x185   : > { %v1768_v36 = vpop.f32.mrb[12].mxu1 }
 0x186   : > { %v1832_v37 = vpop.f32.mrb[12].mxu0  ;;  %v709_v38 = vpop.f32.mrb[13].mxu1 }
 0x187   : > { %v2573_v39 = vadd.f32 %v1832_v37, %v1768_v36  ;;  %v1179_v40 = vpop.f32.mrb[13].mxu0  ;;  %v1769_v41 = vpop.f32.mrb[14].mxu1 }
 0x188   : > { %v2575_v42 = vadd.f32 %v1179_v40, %v709_v38  ;;  %v1833_v43 = vpop.f32.mrb[14].mxu0  ;;  %v712_v44 = vpop.f32.mrb[15].mxu1 }
 0x189   : > { %v2577_v45 = vadd.f32 %v1833_v43, %v1769_v41  ;;  %v1182_v46 = vpop.f32.mrb[15].mxu0 }
 0x18a   : > { %v1849_v47 = vadd.f32 %v1182_v46, %v712_v44 }
 0x18b PF: > { %v1230_v49 = vld [vmem:[%s2580_s24] sm:$0xff]  ;;  %v1231_v50 = vld [vmem:[%s2580_s24 + $0x8] sm:$0xff]  ;;  %v1232_v51 = vld [vmem:[%s2580_s24 + $0x10] sm:$0xff]  ;;  %p1633_p12 = scmp.ne.s32.totalorder %s2233_s18, 1 }
 0x18c   : > { %v1246_v52 = vadd.f32 %v2561_v6, %v1230_v49  ;;  %v1247_v53 = vadd.f32 %v1837_v11, %v1231_v50  ;;  %v1248_v54 = vadd.f32 %v2559_v3, %v1232_v51  ;;  %v1233_v55 = vld [vmem:[%s2580_s24 + $0x18] sm:$0xff]  ;;  %v1234_v56 = vld [vmem:[%s2580_s24 + $0x20] sm:$0xff]  ;;  %v1235_v57 = vld [vmem:[%s2580_s24 + $0x28] sm:$0xff] }
 0x18d   : > { %v1249_v58 = vadd.f32 %v2563_v9, %v1233_v55  ;;  %v1250_v59 = vadd.f32 %v1839_v18, %v1234_v56  ;;  %v1251_v60 = vadd.f32 %v1841_v23, %v1235_v57  ;;  %v1236_v61 = vld [vmem:[%s2580_s24 + $0x30] sm:$0xff]  ;;  %v1237_v62 = vld [vmem:[%s2580_s24 + $0x38] sm:$0xff]  ;;  %v1238_v63 = vld [vmem:[%s2580_s24 + $0x40] sm:$0xff] }
 0x18e   : > { %1262 = vst [vmem:[%s2580_s24] sm:$0xff] %v1246_v52  ;;  %1263 = vst [vmem:[%s2580_s24 + $0x8] sm:$0xff] %v1247_v53  ;;  %v1252_v0 = vadd.f32 %v2565_v15, %v1236_v61  ;;  %v1253_v1 = vadd.f32 %v2567_v21, %v1237_v62  ;;  %v1254_v2 = vadd.f32 %v1843_v30, %v1238_v63  ;;  %v1239_v3 = vld [vmem:[%s2580_s24 + $0x48] sm:$0xff]  ;;  %v1240_v4 = vld [vmem:[%s2580_s24 + $0x50] sm:$0xff] }
 0x18f   : > { %1264 = vst [vmem:[%s2580_s24 + $0x10] sm:$0xff] %v1248_v54  ;;  %v1241_v5 = vld [vmem:[%s2580_s24 + $0x58] sm:$0xff]  ;;  %1265 = vst [vmem:[%s2580_s24 + $0x18] sm:$0xff] %v1249_v58  ;;  %v1255_v6 = vadd.f32 %v1845_v35, %v1239_v3  ;;  %v1256_v7 = vadd.f32 %v2569_v27, %v1240_v4  ;;  %v1242_v9 = vld [vmem:[%s2580_s24 + $0x60] sm:$0xff]  ;;  %1281 = sbr.rel (%p1633_p12) target bundleno = 416 (0x1a0), region = 44 }
 0x190   : > { %1266 = vst [vmem:[%s2580_s24 + $0x20] sm:$0xff] %v1250_v59  ;;  %1267 = vst [vmem:[%s2580_s24 + $0x28] sm:$0xff] %v1251_v60  ;;  %v1257_v8 = vadd.f32 %v2571_v33, %v1241_v5  ;;  %v1243_v10 = vld [vmem:[%s2580_s24 + $0x68] sm:$0xff]  ;;  %v1244_v11 = vld [vmem:[%s2580_s24 + $0x70] sm:$0xff]  ;;  %v1258_v12 = vadd.f32 %v2575_v42, %v1242_v9 }
 0x191   : > { %1268 = vst [vmem:[%s2580_s24 + $0x30] sm:$0xff] %v1252_v0  ;;  %1269 = vst [vmem:[%s2580_s24 + $0x38] sm:$0xff] %v1253_v1  ;;  %v1259_v13 = vadd.f32 %v1849_v47, %v1243_v10  ;;  %v1260_v14 = vadd.f32 %v2573_v39, %v1244_v11  ;;  %v1245_v15 = vld [vmem:[%s2580_s24 + $0x78] sm:$0xff] }
 0x192   : > { %1270 = vst [vmem:[%s2580_s24 + $0x40] sm:$0xff] %v1254_v2  ;;  %1271 = vst [vmem:[%s2580_s24 + $0x48] sm:$0xff] %v1255_v6  ;;  %v1261_v16 = vadd.f32 %v2577_v45, %v1245_v15 }
 0x193   : > { %1272 = vst [vmem:[%s2580_s24 + $0x50] sm:$0xff] %v1256_v7  ;;  %1273 = vst [vmem:[%s2580_s24 + $0x58] sm:$0xff] %v1257_v8 }
 0x194   : > { %1274 = vst [vmem:[%s2580_s24 + $0x60] sm:$0xff] %v1258_v12  ;;  %1275 = vst [vmem:[%s2580_s24 + $0x68] sm:$0xff] %v1259_v13 }
 0x195   : > { %1276 = vst [vmem:[%s2580_s24 + $0x70] sm:$0xff] %v1260_v14  ;;  %1277 = vst [vmem:[%s2580_s24 + $0x78] sm:$0xff] %v1261_v16  ;;  %v1282_v17 = vld [vmem:[%s2580_s24] sm:$0xff] (!%p1633_p12)  ;;  %v1283_v18 = vld [vmem:[%s2580_s24 + $0x8] sm:$0xff] (!%p1633_p12) }
 0x196   : > { %v1284_v19 = vld [vmem:[%s2580_s24 + $0x10] sm:$0xff]  ;;  %v1298_v20 = vmax.f32 %v1282_v17, 0.0  ;;  %v1299_v21 = vmax.f32 %v1283_v18, 0.0  ;;  %v1285_v23 = vld [vmem:[%s2580_s24 + $0x18] sm:$0xff] }
 0x197   : > { %v1300_v22 = vmax.f32 %v1284_v19, 0.0  ;;  %v1286_v24 = vld [vmem:[%s2580_s24 + $0x20] sm:$0xff]  ;;  %v1287_v25 = vld [vmem:[%s2580_s24 + $0x28] sm:$0xff]  ;;  %v1301_v26 = vmax.f32 %v1285_v23, 0.0 }
 0x198   : > { %v1302_v27 = vmax.f32 %v1286_v24, 0.0  ;;  %v1303_v28 = vmax.f32 %v1287_v25, 0.0  ;;  %v1288_v29 = vld [vmem:[%s2580_s24 + $0x30] sm:$0xff]  ;;  %v1289_v30 = vld [vmem:[%s2580_s24 + $0x38] sm:$0xff]  ;;  %1314 = vst [vmem:[%s2580_s24] sm:$0xff] %v1298_v20  ;;  %1315 = vst [vmem:[%s2580_s24 + $0x8] sm:$0xff] %v1299_v21 }
 0x199   : > { %v1290_v31 = vld [vmem:[%s2580_s24 + $0x40] sm:$0xff]  ;;  %1316 = vst [vmem:[%s2580_s24 + $0x10] sm:$0xff] %v1300_v22  ;;  %v1304_v32 = vmax.f32 %v1288_v29, 0.0  ;;  %v1305_v33 = vmax.f32 %v1289_v30, 0.0  ;;  %v1291_v35 = vld [vmem:[%s2580_s24 + $0x48] sm:$0xff]  ;;  %1317 = vst [vmem:[%s2580_s24 + $0x18] sm:$0xff] %v1301_v26 }
 0x19a   : > { %v1306_v34 = vmax.f32 %v1290_v31, 0.0  ;;  %v1292_v36 = vld [vmem:[%s2580_s24 + $0x50] sm:$0xff]  ;;  %v1293_v37 = vld [vmem:[%s2580_s24 + $0x58] sm:$0xff]  ;;  %1318 = vst [vmem:[%s2580_s24 + $0x20] sm:$0xff] %v1302_v27  ;;  %1319 = vst [vmem:[%s2580_s24 + $0x28] sm:$0xff] %v1303_v28  ;;  %v1307_v38 = vmax.f32 %v1291_v35, 0.0 }
 0x19b   : > { %v1308_v39 = vmax.f32 %v1292_v36, 0.0  ;;  %v1309_v40 = vmax.f32 %v1293_v37, 0.0  ;;  %v1294_v41 = vld [vmem:[%s2580_s24 + $0x60] sm:$0xff]  ;;  %v1295_v42 = vld [vmem:[%s2580_s24 + $0x68] sm:$0xff]  ;;  %1320 = vst [vmem:[%s2580_s24 + $0x30] sm:$0xff] %v1304_v32  ;;  %1321 = vst [vmem:[%s2580_s24 + $0x38] sm:$0xff] %v1305_v33 }
 0x19c   : > { %v1296_v43 = vld [vmem:[%s2580_s24 + $0x70] sm:$0xff]  ;;  %1322 = vst [vmem:[%s2580_s24 + $0x40] sm:$0xff] %v1306_v34  ;;  %v1310_v44 = vmax.f32 %v1294_v41, 0.0  ;;  %v1311_v45 = vmax.f32 %v1295_v42, 0.0  ;;  %v1297_v47 = vld [vmem:[%s2580_s24 + $0x78] sm:$0xff]  ;;  %1323 = vst [vmem:[%s2580_s24 + $0x48] sm:$0xff] %v1307_v38 }
 0x19d   : > { %v1312_v46 = vmax.f32 %v1296_v43, 0.0  ;;  %1324 = vst [vmem:[%s2580_s24 + $0x50] sm:$0xff] %v1308_v39  ;;  %1325 = vst [vmem:[%s2580_s24 + $0x58] sm:$0xff] %v1309_v40  ;;  %v1313_v48 = vmax.f32 %v1297_v47, 0.0 }
 0x19e   : > { %1326 = vst [vmem:[%s2580_s24 + $0x60] sm:$0xff] %v1310_v44  ;;  %1327 = vst [vmem:[%s2580_s24 + $0x68] sm:$0xff] %v1311_v45 }
 0x19f   : > { %1328 = vst [vmem:[%s2580_s24 + $0x70] sm:$0xff] %v1312_v46  ;;  %1329 = vst [vmem:[%s2580_s24 + $0x78] sm:$0xff] %v1313_v48 }
 0x1a0 PF: > { %s1641_s18 = sshll.u32 %s2237_s19, 11  ;;  %s1344_s21 = sshll.u32 %s2580_s24, 4  ;;  %s2681_s21 = int_to_ptr.vmem [resolvable:$true] %s1344_s21 }
 0x1a1   : > { %s2678_s6 = scalar_lea.hbm %s2763_s2, %s1641_s18  ;;  %s2685_s30 = scalar_lea.sflag [#allocation4], %s265_s3 }
 0x1a2   : > { %s2099_s26 = scalar_lea.vmem %s2681_s21, 2048  ;;  %s2265_s19 = smov [#allocation7]  }
 0x1a3   : > { %p2100_p13 = scmp.ne.s32.totalorder %s2681_s21, %s2099_s26  ;;  %s2103_s8 = sshll.u32 %s2265_s19, 4  ;;  %s2104_s8 = int_to_ptr.vmem [resolvable:$false] %s2103_s8 }
 0x1a4   : > { %s2105_s23 = scalar_lea.vmem %s2104_s8, 4096  ;;  %p2106_p4 = scmp.lt.s32.totalorder %s2681_s21, %s2104_s8 }
 0x1a5   : > { %p2101_p0 = pnand %p2100_p13, %p2422_p9  ;;  %p2107_p2 = scmp.lt.s32.totalorder %s2105_s23, %s2099_s26 }
 0x1a7   : > { %p2102_p1 = pneg %p2101_p0  ;;  %p2108_p5 = por %p2107_p2, %p2106_p4 }
 0x1a9   : > { %p2109_p6 = pnand %p2108_p5, %p2102_p1 }
 0x1ab   : > { %2112 = shalt.err (!%p2109_p6)
}
 0x1ac   : > { %s2113_s29 = scalar_lea.hbm %s2678_s6, 2048  ;;  %s2117_s7 = scalar_lea.hbm %s2763_s2, 4096 }
 0x1ad   : > { %p2114_p3 = scmp.ne.s32.totalorder %s2678_s6, %s2113_s29  ;;  %p2118_p8 = scmp.lt.u32.totalorder %s2678_s6, %s2763_s2 }
 0x1ae   : > { %p2119_p12 = scmp.lt.u32.totalorder %s2117_s7, %s2113_s29  ;;  %p2121_p0 = scmp.lt.u32.totalorder %s2113_s29, %s2678_s6 }
 0x1af   : > { %p2115_p10 = pnand %p2114_p3, %p2422_p9 }
 0x1b0   : > { %p2120_p13 = por %p2119_p12, %p2118_p8 }
 0x1b1   : > { %p2116_p11 = pneg %p2115_p10 }
 0x1b2   : > { %p2122_p1 = por %p2121_p0, %p2120_p13 }
 0x1b4   : > { %p2123_p4 = pnand %p2122_p1, %p2116_p11 }
 0x1b6   : > { %2126 = shalt.err (!%p2123_p4)
}
 0x1b7   : > { %s2266_s25 = smov 128   ;;  %s2267_s3 = smov 8  }
 0x1b8   : > { %1900 = dma.vmem_to_hbm [thread:$0]  (%p2422_p9), %s2681_s21, 2048, %s2678_s6, %s2685_s30, %s2266_s25, %s2266_s25, %s2267_s3  }
 0x1b9 PF: > { %s2789_s11 = sld [smem:[#allocation17_spill]]  ;;  %p1906_p2 = scmp.ge.s32.totalorder %s2249_s22, 2 }
 0x1bb   : > { %p1903_p5 = pnand %p1906_p2, %p2426_p7 }
 0x1bf   : > { %s1359_s18 = sand.u32 1, %s2789_s11  }
 0x1c0   : > { %s1360_s5 = scalar_lea.sflag [#allocation4], %s1359_s18 }
 0x1c1   : > { %2192 = dma.done.wait (!%p1903_p5), %s1360_s5, 2048  }
 0x1c2   : > { %2194 = vsyncadd (!%p1903_p5), %s1360_s5, 4294965248  ;;  %s21_s22 = sadd.s32 1, %s2249_s22   ;;  %s2792_s4 = sld [smem:[#allocation18_spill]] }
 0x1c3   : > { %p2714_p6 = scmp.ge.s32.totalorder %s21_s22, 6   ;;  %s2793_s11 = sld [smem:[#allocation24_spill]] }
 0x1c4   : > { %s2794_s6 = sld [smem:[#allocation22_spill]]  ;;  %s2795_s21 = sld [smem:[#allocation23_spill]] }
 0x1c5   : > { %s2796_s19 = sld [smem:[#allocation19_spill]]  ;;  %s2797_s30 = sld [smem:[#allocation20_spill]] }
 0x1c6   : > { %s2798_s26 = sld [smem:[#allocation21_spill]]  ;;  %s2800_s9 = smov %s2201_s10 }
 0x1c7   : > { %s2802_s12 = smov %s2213_s13  ;;  %s2803_s13 = smov %s2217_s14 }
 0x1c8   : > { %s2801_s10 = smov %s2792_s4  ;;  %s2805_s15 = smov %s2225_s16 }
 0x1c9   : > { %s2806_s16 = smov %s2229_s17  ;;  %s2808_s18 = smov %s2241_s20 }
 0x1ca   : > { %s2804_s14 = smov %s2794_s6  ;;  %s2807_s17 = smov %s2795_s21 }
 0x1cb   : > { %s2809_s20 = smov %s2797_s30  ;;  %20 = sbr.rel (!%p2714_p6) target bundleno = 12 (0xc), region = 110 }
 0x1cc   : > { %s2810_s21 = smov %s2798_s26 }
 0x1d2   :  { %1365 = vsyncpa [#allocation3], 1 }
 0x1d3   :  { %1367 = vsyncpa [#allocation3 + $0x1], 1 }
 0x1d4   :  { %1368 = vsyncpa [#allocation6], 1 }
 0x1d5   :  { %1370 = vsyncpa [#allocation6 + $0x1], 1 }
 0x1d6   :  { %1371 = vsyncpa [#allocation4], 1 }
 0x1d7   :  { %1373 = vsyncpa [#allocation4 + $0x1], 1 }

</bundles_post_ra>
